<compile_context>
chip_gen: v5e
topology: v5e:2x2
jax: 0.10.0
libtpu: 0.0.40
codegen_flags: <defaults>
</compile_context>

<pallas_src>
import math

import numpy as np
import jax
import jax.numpy as jnp
from jax.experimental import pallas as pl
from jax.experimental.pallas import tpu as pltpu


def _round_up(v, m):
    return ((v + m - 1) // m) * m


def _block_spec(shape, index_map, buffer_count=None):
    """BlockSpec helper: request reduced buffering for grid-invariant operands
    when this jax version supports `pipeline_mode`; otherwise fall back."""
    if buffer_count is not None:
        try:
            return pl.BlockSpec(shape, index_map,
                                pipeline_mode=pl.Buffered(buffer_count))
        except (TypeError, AttributeError):
            pass
    return pl.BlockSpec(shape, index_map)


def _fno1d_encoder_kernel(xg_ref, w_ref, b_ref, out_ref):
    # xg_ref : (TB, TK)  bf16  batch tile of zero-padded [x | grid]
    # w_ref  : (TK, Ep)  bf16  K-tile of the fully folded weight
    # b_ref  : (1,  Ep)  f32   fully folded bias (fc0 + rfft + spectral + head)
    # out_ref: (TB, Ep)  f32   lane-dense output tile, resident across the K axis
    k = pl.program_id(1)

    @pl.when(k == 0)
    def _():
        out_ref[...] = jnp.broadcast_to(b_ref[...], out_ref.shape)

    out_ref[...] += jnp.dot(xg_ref[...], w_ref[...],
                            preferred_element_type=jnp.float32)


def fold_fno1d_encoder_params(params, n_points, *, modes1, width, padding=2):
    """One-time fold of fc0 -> rfft -> spectral multiply -> head into a single
    real (2N, E) matrix + (1, E) bias.  Call once per parameter set and reuse
    the result for every forward call."""
    N = n_points
    M, W = modes1, width
    Np = N + padding
    assert M <= Np // 2 + 1, "modes1 must not exceed the rfft length"
    E = int(params["head_b"].shape[0])
    F = 2 * M * W

    w0 = jnp.asarray(params["fc0_w"], jnp.float32)      # (W, 2)  torch Linear
    b0 = jnp.asarray(params["fc0_b"], jnp.float32)      # (W,)
    w1r = jnp.asarray(params["w1_re"], jnp.float32)     # (W, W, M)
    w1i = jnp.asarray(params["w1_im"], jnp.float32)     # (W, W, M)
    hw = jnp.asarray(params["head_w"], jnp.float32)     # (E, F)
    hb = jnp.asarray(params["head_b"], jnp.float32)     # (E,)

    # Truncated rfft basis for the first M modes (zero-pad columns vanish).
    n_idx = np.arange(N, dtype=np.float64)[None, :]
    k_idx = np.arange(M, dtype=np.float64)[:, None]
    ang = 2.0 * np.pi * k_idx * n_idx / float(Np)
    cr = jnp.asarray(np.cos(ang), jnp.float32)          # (M, N)  Re(e^{-i t})
    ci = jnp.asarray(-np.sin(ang), jnp.float32)         # (M, N)  Im(e^{-i t})

    def proj(vec):  # contract an fc0 column (W,) with the spectral weights
        return (jnp.einsum('i,iok->ok', vec, w1r),      # (W, M)
                jnp.einsum('i,iok->ok', vec, w1i))      # (W, M)

    pxr, pxi = proj(w0[:, 0])   # x input channel
    pgr, pgi = proj(w0[:, 1])   # grid input channel
    pbr, pbi = proj(b0)         # fc0 bias

    def fold_input(pr, pi):
        # feature layout matches torch cat([real, imag], -1).view(B, -1):
        #   f = o*(2M) + k  (real) ;  f = o*(2M) + M + k  (imag)
        re = jnp.einsum('kn,ok->nok', cr, pr) - jnp.einsum('kn,ok->nok', ci, pi)
        im = jnp.einsum('kn,ok->nok', cr, pi) + jnp.einsum('kn,ok->nok', ci, pr)
        return jnp.concatenate([re, im], axis=-1).reshape(N, F)     # (N, F)

    w_spec = jnp.concatenate([fold_input(pxr, pxi),
                              fold_input(pgr, pgi)], axis=0)        # (2N, F)
    scr = jnp.sum(cr, axis=1)                                       # (M,)
    sci = jnp.sum(ci, axis=1)                                       # (M,)
    b_re = scr[None, :] * pbr - sci[None, :] * pbi                  # (W, M)
    b_im = scr[None, :] * pbi + sci[None, :] * pbr                  # (W, M)
    b_spec = jnp.concatenate([b_re, b_im], axis=-1).reshape(1, F)   # (1, F)

    # Fold the head in as well -> a single (2N, E) weight and (1, E) bias.
    w_comb = w_spec @ hw.T                                          # (2N, E)
    b_comb = b_spec @ hw.T + hb[None, :]                            # (1, E)

    # Pad K (= 2N) and E to multiples of 128 with zeros: full MXU depth,
    # lane-dense unmasked stores.  Keep the whole weight per step while it is
    # small; K-tile it otherwise so v7x's 64 MiB VMEM is never exceeded.
    K = 2 * N
    Ep = _round_up(E, 128)
    Kp128 = _round_up(K, 128)
    if Kp128 * Ep * 2 <= 8 * 1024 * 1024:   # bf16 bytes of the folded weight
        TK = Kp128
    else:
        TK = 1024
    Kp = _round_up(K, TK)

    w_pad = jnp.zeros((Kp, Ep), jnp.float32).at[:K, :E].set(w_comb)
    b_pad = jnp.zeros((1, Ep), jnp.float32).at[:, :E].set(b_comb)

    return {
        "w": w_pad.astype(jnp.bfloat16),    # bf16 operands, f32 accumulation
        "b": b_pad,                         # bias stays f32
        "n_points": N, "emb_dim": E, "Kp": Kp, "TK": TK, "Ep": Ep,
    }


def fno1d_encoder_forward(x, grid, folded):
    """JAX/Pallas equivalent of FNO1DEncoder.forward(x, grid) given folded params."""
    B, N = x.shape
    assert N == folded["n_points"], "folded params were built for a different N"
    E, Kp, TK, Ep = folded["emb_dim"], folded["Kp"], folded["TK"], folded["Ep"]
    K = 2 * N

    # Batch tile: multiple of 16 (bf16 sublane pack).  Split so the "parallel"
    # batch axis has >= 2 steps once B >= 32 (both v7x TensorCores busy); use
    # 256-row tiles at large B to match the 256-wide MXU on v6e/v7x.
    if B >= 512:
        TB = 256
    else:
        TB = min(128, _round_up(max(1, (B + 1) // 2), 16))
    Bp = _round_up(B, TB)

    # bf16 inputs before concat/pad -> half the staged activation bytes.
    xg = jnp.concatenate([x.astype(jnp.bfloat16), grid.astype(jnp.bfloat16)],
                         axis=-1)                                    # (B, 2N)
    xg = jnp.pad(xg, ((0, Bp - B), (0, Kp - K)))                     # (Bp, Kp)

    n_b, n_k = Bp // TB, Kp // TK

    # Scoped VMEM: actual footprint + headroom, never the full v7x VMEM.
    w_bufs = 1 if n_k == 1 else 2
    footprint = (2 * TB * TK * 2            # xg tiles (double-buffered, bf16)
                 + w_bufs * TK * Ep * 2     # folded weight tile(s), bf16
                 + Ep * 4                   # folded bias, f32
                 + 2 * TB * Ep * 4)         # output tiles, f32
    vmem_limit = int(min(48 * 1024 * 1024,
                         max(32 * 1024 * 1024, 2 * footprint)))

    out = pl.pallas_call(
        _fno1d_encoder_kernel,
        out_shape=jax.ShapeDtypeStruct((Bp, Ep), jnp.float32),
        grid_spec=pltpu.PrefetchScalarGridSpec(
            num_scalar_prefetch=0,
            grid=(n_b, n_k),
            in_specs=[
                pl.BlockSpec((TB, TK), lambda b, k: (b, k)),     # [x | grid]
                _block_spec((TK, Ep), lambda b, k: (k, 0),       # folded weight
                            buffer_count=1 if n_k == 1 else None),
                _block_spec((1, Ep), lambda b, k: (0, 0),        # folded bias
                            buffer_count=1),
            ],
            out_specs=pl.BlockSpec((TB, Ep), lambda b, k: (b, 0)),
        ),
        compiler_params=pltpu.CompilerParams(
            dimension_semantics=("parallel", "arbitrary"),
            vmem_limit_bytes=vmem_limit,
        ),
    )(xg, folded["w"], folded["b"])

    # TODO(synk): emit the output block as bf16 if the downstream consumer is bf16.
    return out[:B, :E]


def _reference_forward_np(x, grid, params, modes1, width, padding=2):
    """float64 numpy reference matching the PyTorch FNO1DEncoder.forward."""
    x = np.asarray(x, np.float64)
    g = np.asarray(grid, np.float64)
    B, N = x.shape
    w0 = np.asarray(params["fc0_w"], np.float64)
    b0 = np.asarray(params["fc0_b"], np.float64)
    w1 = (np.asarray(params["w1_re"], np.float64)
          + 1j * np.asarray(params["w1_im"], np.float64))
    hw = np.asarray(params["head_w"], np.float64)
    hb = np.asarray(params["head_b"], np.float64)

    inp = np.stack([x, g], axis=-1)                      # (B, N, 2)
    h = inp @ w0.T + b0                                  # (B, N, width)
    hp = np.transpose(h, (0, 2, 1))                      # (B, width, N)
    hp = np.pad(hp, ((0, 0), (0, 0), (0, padding)))      # (B, width, N+padding)
    xf = np.fft.rfft(hp, axis=-1)                        # (B, width, Np//2+1)
    out_ft = np.einsum('bix,iox->box', xf[:, :, :modes1], w1)
    out = np.concatenate([out_ft.real, out_ft.imag], axis=-1)   # (B, width, 2M)
    out = out.reshape(B, -1)
    return out @ hw.T + hb


if __name__ == "__main__":
    # Small, module-consistent hyperparameters.
    B, N = 4, 32                    # batch, spatial points
    modes1, width, emb_dim = 4, 16, 128

    key = jax.random.PRNGKey(0)
    ks = jax.random.split(key, 8)

    def uniform_init(k, shape, fan_in):
        bound = 1.0 / math.sqrt(fan_in)
        return jax.random.uniform(k, shape, jnp.float32, -bound, bound)

    scale = 1.0 / (width * width)
    params = {
        "fc0_w": uniform_init(ks[0], (width, 2), 2),
        "fc0_b": uniform_init(ks[1], (width,), 2),
        "w1_re": scale * jax.random.uniform(ks[2], (width, width, modes1), jnp.float32),
        "w1_im": scale * jax.random.uniform(ks[3], (width, width, modes1), jnp.float32),
        "head_w": uniform_init(ks[4], (emb_dim, width * modes1 * 2), width * modes1 * 2),
        "head_b": uniform_init(ks[5], (emb_dim,), width * modes1 * 2),
    }
    x = jax.random.normal(ks[6], (B, N), jnp.float32)
    grid = jnp.tile(jnp.linspace(0.0, 1.0, N, dtype=jnp.float32)[None, :], (B, 1))

    # Fold once per parameter set (hoisted out of the per-step forward).
    folded = fold_fno1d_encoder_params(params, N, modes1=modes1, width=width)
    folded = jax.tree_util.tree_map(
        lambda a: jax.block_until_ready(a) if isinstance(a, jax.Array) else a, folded)

    out = fno1d_encoder_forward(x, grid, folded)
    out = jax.block_until_ready(out)

    ref = _reference_forward_np(np.asarray(x), np.asarray(grid),
                                {k: np.asarray(v) for k, v in params.items()},
                                modes1, width)
    # tolerance covers bf16-operand / f32-accumulate rounding against the f64 ref
    np.testing.assert_allclose(np.asarray(out), ref, rtol=2e-2, atol=3e-3)
    print("KERNEL_OK")
</pallas_src>

<mosaic_0001>
module attributes {stable_mosaic.version = 11 : i64} {
  func.func @_fno1d_encoder_kernel(%arg0: i32, %arg1: i32, %arg2: memref<16x128xbf16, #tpu.memory_space<vmem>>, %arg3: memref<128x128xbf16, #tpu.memory_space<vmem>>, %arg4: memref<1x128xf32, #tpu.memory_space<vmem>>, %arg5: memref<16x128xf32, #tpu.memory_space<vmem>>) attributes {dimension_semantics = [#tpu.dimension_semantics<parallel>, #tpu.dimension_semantics<arbitrary>], iteration_bounds = array<i64: 1, 1>, scalar_prefetch = 0 : i64, scratch_operands = 0 : i64, tpu.core_type = #tpu.core_type<tc>, window_params = [{transform_indices = @transform_0, window_bounds = array<i64: 16, 128>}, {pipeline_mode = #tpu.pipeline_mode<synchronous>, transform_indices = @transform_1, window_bounds = array<i64: 128, 128>}, {pipeline_mode = #tpu.pipeline_mode<synchronous>, transform_indices = @transform_2, window_bounds = array<i64: 1, 128>}, {transform_indices = @transform_3, window_bounds = array<i64: 16, 128>}]} {
    %c0_i32 = arith.constant 0 : i32
    %0 = arith.cmpi eq, %arg1, %c0_i32 : i32
    %1 = arith.extui %0 : i1 to i32
    %c0_i32_0 = arith.constant 0 : i32
    %2 = arith.cmpi ne, %1, %c0_i32_0 : i32
    scf.if %2 {
      %c0_8 = arith.constant 0 : index
      %c0_9 = arith.constant 0 : index
      %9 = vector.load %arg4[%c0_8, %c0_9] : memref<1x128xf32, #tpu.memory_space<vmem>>, vector<1x128xf32>
      %10 = vector.shape_cast %9 : vector<1x128xf32> to vector<1x128xf32>
      %11 = vector.broadcast %10 : vector<1x128xf32> to vector<16x128xf32>
      %c0_10 = arith.constant 0 : index
      %c0_11 = arith.constant 0 : index
      %12 = vector.load %arg5[%c0_10, %c0_11] : memref<16x128xf32, #tpu.memory_space<vmem>>, vector<16x128xf32>
      tpu.vector_store %arg5[%c0_10, %c0_11], %11 {strides = array<i32>} : memref<16x128xf32, #tpu.memory_space<vmem>>, vector<16x128xf32>,
    } else {
    }
    %c0 = arith.constant 0 : index
    %c0_1 = arith.constant 0 : index
    %3 = vector.load %arg5[%c0, %c0_1] : memref<16x128xf32, #tpu.memory_space<vmem>>, vector<16x128xf32>
    %c0_2 = arith.constant 0 : index
    %c0_3 = arith.constant 0 : index
    %4 = vector.load %arg2[%c0_2, %c0_3] : memref<16x128xbf16, #tpu.memory_space<vmem>>, vector<16x128xbf16>
    %c0_4 = arith.constant 0 : index
    %c0_5 = arith.constant 0 : index
    %5 = vector.load %arg3[%c0_4, %c0_5] : memref<128x128xbf16, #tpu.memory_space<vmem>>, vector<128x128xbf16>
    %cst = arith.constant dense<0.000000e+00> : vector<16x128xf32>
    %6 = tpu.matmul %4, %5, %cst {dimension_numbers = #tpu.dot_dimension_numbers<[1], [0], [0], [1], [0, 0, 1, 1], [], []>} : vector<16x128xbf16>, vector<128x128xbf16>, vector<16x128xf32> -> vector<16x128xf32>
    %7 = arith.addf %3, %6 : vector<16x128xf32>
    %c0_6 = arith.constant 0 : index
    %c0_7 = arith.constant 0 : index
    %8 = vector.load %arg5[%c0_6, %c0_7] : memref<16x128xf32, #tpu.memory_space<vmem>>, vector<16x128xf32>
    tpu.vector_store %arg5[%c0_6, %c0_7], %7 {strides = array<i32>} : memref<16x128xf32, #tpu.memory_space<vmem>>, vector<16x128xf32>,
    return
  }
  func.func @transform_0(%arg0: i32, %arg1: i32) -> (i32, i32) {
    %c0_i32 = arith.constant 0 : i32
    return %arg0, %arg1 : i32, i32
  }
  func.func @transform_1(%arg0: i32, %arg1: i32) -> (i32, i32) {
    %c0_i32 = arith.constant 0 : i32
    %c0_i32_0 = arith.constant 0 : i32
    return %arg1, %c0_i32 : i32, i32
  }
  func.func @transform_2(%arg0: i32, %arg1: i32) -> (i32, i32) {
    %c0_i32 = arith.constant 0 : i32
    %c0_i32_0 = arith.constant 0 : i32
    %c0_i32_1 = arith.constant 0 : i32
    return %c0_i32, %c0_i32_0 : i32, i32
  }
  func.func @transform_3(%arg0: i32, %arg1: i32) -> (i32, i32) {
    %c0_i32 = arith.constant 0 : i32
    %c0_i32_0 = arith.constant 0 : i32
    return %arg0, %c0_i32 : i32, i32
  }
}

</mosaic_0001>

<bundles_post_ra>
// kernel: tpu_custom_call.1
= control target key start
LH: loop header
LB: loop body
LE: loop exit
PB: predicated region body
PF: predicated region fallthrough
CT: control target
= control target key end

     0   :  { %8 = vsyncpa [#allocation3], 0  ;;  %s339_s0 = inlined_call_operand.hbm [shape: bf16[16,128], index: 0, kind: input, shape index: {}]   ;;  %s340_s1 = inlined_call_operand.hbm [shape: bf16[128,128], index: 1, kind: input, shape index: {}]   ;;  %s341_s2 = inlined_call_operand.vmem [shape: f32[1,128], index: 2, kind: input, shape index: {}]   ;;  %s342_s3 = inlined_call_operand.hbm [shape: f32[16,128], index: 3, kind: output, shape index: {}]  }
   0x1   :  { %9 = vsyncpa [#allocation6], 0 }
   0x2   :  { %10 = vsyncpa [#allocation4], 0  ;;  %s15_s14 = sshll.u32 %s339_s0, 4  ;;  %s300_s15 = smov [#allocation2]   ;;  %s16_s14 = int_to_ptr.hbm [resolvable:$true] %s15_s14 }
   0x3   :  { %s17_s16 = sshll.u32 %s300_s15, 4  ;;  %s28_s19 = sshll.u32 %s340_s1, 4  ;;  %s18_s16 = int_to_ptr.vmem [resolvable:$true] %s17_s16  ;;  %s29_s19 = int_to_ptr.hbm [resolvable:$true] %s28_s19 }
   0x4   :  { %s301_s20 = smov 64   ;;  %s302_s21 = smov 4  }
   0x5   :  { %23 = dma.hbm_to_vmem [thread:$0]  %s16_s14, 128, %s18_s16, [#allocation3], %s301_s20, %s301_s20, %s302_s21  }
   0x6   :  { %s303_s22 = smov [#allocation5]  }
   0x7   :  { %s30_s23 = sshll.u32 %s303_s22, 4  ;;  %s31_s23 = int_to_ptr.vmem [resolvable:$true] %s30_s23 }
   0x8   :  { %36 = dma.hbm_to_vmem [thread:$0]  %s29_s19, 1024, %s31_s23, [#allocation6], %s301_s20, %s301_s20, %s302_s21  }
   0x9   :  { %294 = dma.done.wait [#allocation3], 128  }
   0xa   :  { %295 = vsyncadd [#allocation3], 4294967168 }
   0xb   :  { %296 = dma.done.wait [#allocation6], 1024  }
   0xc   :  { %297 = vsyncadd [#allocation6], 4294966272  ;;  %v213_v0 = vld [vmem:[#allocation5 + $0x38] sm:$0xff]  ;;  %v212_v1 = vld [vmem:[#allocation5 + $0x30] sm:$0xff]  ;;  %s304_s24 = smov [#allocation7]   ;;  %s155_s28 = sshll.u32 %s342_s3, 4  ;;  %s156_s28 = int_to_ptr.hbm [resolvable:$true] %s155_s28 }
   0xd   :  { %131 = vmatpush.bf16.msra.mxu0 %v213_v0  ;;  %v211_v2 = vld [vmem:[#allocation5 + $0x28] sm:$0xff]  ;;  %v210_v3 = vld [vmem:[#allocation5 + $0x20] sm:$0xff]  ;;  %v209_v4 = vld [vmem:[#allocation5 + $0x18] sm:$0xff]  ;;  %s153_s25 = sshll.u32 %s304_s24, 4  ;;  %s305_s29 = smov 128   ;;  %s154_s25 = int_to_ptr.vmem [resolvable:$true] %s153_s25 }
   0xe   :  { %v208_v5 = vld [vmem:[#allocation5 + $0x10] sm:$0xff]  ;;  %v207_v6 = vld [vmem:[#allocation5 + $0x8] sm:$0xff]  ;;  %v206_v7 = vld [vmem:[#allocation5] sm:$0xff]  ;;  %s306_s30 = smov 8  }
   0xf   :  { %v205_v8 = vld [vmem:[#allocation2] sm:$0xff] }
  0x10   :  { %v221_v9 = vld [vmem:[%s341_s2] ss:$0 sm:$0xff] }
  0x11   :  { %132 = vmatpush.bf16.msra.mxu0 %v212_v1 }
  0x15   :  { %133 = vmatpush.bf16.msra.mxu0 %v211_v2 }
  0x19   :  { %134 = vmatpush.bf16.msra.mxu0 %v210_v3 }
  0x1d   :  { %135 = vmatpush.bf16.msra.mxu0 %v209_v4 }
  0x21   :  { %136 = vmatpush.bf16.msra.mxu0 %v208_v5 }
  0x25   :  { %137 = vmatpush.bf16.msra.mxu0 %v207_v6 }
  0x29   :  { %138 = vmatpush.bf16.msra.mxu0 %v206_v7 }
  0x2c   :  { %139 = vmatmul.bf16.vlgmr.msra.gmra.mxu0 %v205_v8 }
  0xa9   :  { %v140_v10 = vpop.f32.mrf.mxu0 }
  0xaa   :  { %v145_v11 = vadd.f32 %v221_v9, %v140_v10 }
  0xac   :  { %147 = vst [vmem:[#allocation7] sm:$0xff] %v145_v11 }
  0xb1   :  { %v142_v12 = vpop.f32.mrf.mxu0 }
  0xb2   :  { %v146_v13 = vadd.f32 %v221_v9, %v142_v12 }
  0xb4   :  { %148 = vst [vmem:[#allocation7 + $0x8] sm:$0xff] %v146_v13 }
  0xb5   :  { %161 = dma.vmem_to_hbm [thread:$0]  %s154_s25, 256, %s156_s28, [#allocation4], %s305_s29, %s305_s29, %s306_s30  }
  0xb6   :  { %298 = dma.done.wait [#allocation4], 256  }
  0xb7   :  { %299 = vsyncadd [#allocation4], 4294967040 }
  0xb8   :  { %166 = vsyncpa [#allocation3], 1 }
  0xb9   :  { %167 = vsyncpa [#allocation6], 1 }
  0xba   :  { %168 = vsyncpa [#allocation4], 1 }

</bundles_post_ra>
